<compile_context>
chip_gen: v5e
topology: v5e:2x2
jax: 0.10.0
libtpu: 0.0.40
codegen_flags: <defaults>
</compile_context>

<pallas_src>
import functools

import jax
import jax.numpy as jnp
from jax import lax
from jax.experimental import pallas as pl
from jax.experimental.pallas import tpu as pltpu


def _focal_loss_kernel(*refs, gamma, n_total, use_alpha, mask_rows):
    if use_alpha:
        x_ref, t_ref, a_ref, out_ref = refs
    else:
        x_ref, t_ref, out_ref = refs
        a_ref = None

    j = pl.program_id(1)

    @pl.when(j == 0)
    def _init():
        out_ref[...] = jnp.zeros_like(out_ref)

    x = x_ref[...].astype(jnp.float32)            # (TN, C)
    t = t_ref[...]                                # (TN, 1) int32
    tn = x.shape[0]

    # log-softmax pieces over the class (lane) axis.
    m = jnp.max(x, axis=-1, keepdims=True)                       # (TN, 1)
    s = jnp.sum(jnp.exp(x - m), axis=-1, keepdims=True)          # (TN, 1)

    # gather the target logit via a one-hot mask (single masked XLU reduce).
    col = lax.broadcasted_iota(jnp.int32, x.shape, 1)
    x_t = jnp.sum(jnp.where(col == t, x, 0.0), axis=-1, keepdims=True)  # (TN, 1)

    log_p_t = x_t - m - jnp.log(s)                # (TN, 1); never -inf
    p_t = jnp.exp(log_p_t)
    one_m = 1.0 - p_t

    # (1 - p_t) ** gamma : small integer gamma -> plain VPU multiplies.
    if isinstance(gamma, int) and 0 <= gamma <= 8:
        focal = None
        for _ in range(gamma):
            focal = one_m if focal is None else focal * one_m
        if focal is None:
            focal = jnp.ones_like(one_m)
    else:
        focal = one_m ** jnp.float32(gamma)

    loss = focal * (-log_p_t)                     # (TN, 1)
    if use_alpha:
        loss = loss * a_ref[...].astype(jnp.float32)

    if mask_rows:
        # zero contributions of padded rows in the (possibly ragged) tail.
        step = pl.program_id(0) * pl.num_programs(1) + j
        rows = step * tn + lax.broadcasted_iota(jnp.int32, (tn, 1), 0)
        loss = jnp.where(rows < n_total, loss, 0.0)

    out_ref[...] += loss.reshape(out_ref.shape)


def _round_down(x, m):
    return (x // m) * m


def _round_up(x, m):
    return ((x + m - 1) // m) * m


def focal_loss(logits, targets, alpha=None, gamma=2, reduction="mean", *,
               row_tile=None, num_parallel=2,
               vmem_budget_bytes=24 * 1024 * 1024):
    """logits: float[N, C]; targets: int[N]; alpha: optional float[C]."""
    N, C = logits.shape
    itemsize = jnp.dtype(logits.dtype).itemsize
    # sublane alignment of the logits tile: 8 for 32-bit, 16 for bf16/fp16.
    align = 8 if itemsize >= 4 else 16
    n_min = _round_up(N, align)

    if row_tile is None:
        # double-buffered logits tile dominates VMEM; targets/alpha/out are tiny.
        per_row = 2 * C * itemsize + 2 * 4 + 2 * 4 + 4
        row_tile = vmem_budget_bytes // per_row
    row_tile = max(align, _round_down(min(int(row_tile), 1024, n_min), align))

    num_blocks = pl.cdiv(N, row_tile)
    n_par = max(1, min(int(num_parallel), num_blocks))   # megacore chunks (v7x)
    steps = pl.cdiv(num_blocks, n_par)
    n_pad = n_par * steps * row_tile
    pad = n_pad - N

    logits_p = jnp.pad(logits, ((0, pad), (0, 0)))
    targets_p = jnp.pad(targets.astype(jnp.int32), (0, pad)).reshape(n_pad, 1)

    use_alpha = alpha is not None
    args = [logits_p, targets_p]
    in_specs = [
        pl.BlockSpec((row_tile, C), lambda i, j: (i * steps + j, 0)),
        pl.BlockSpec((row_tile, 1), lambda i, j: (i * steps + j, 0)),
    ]
    if use_alpha:
        # NOTE: the torch module broadcasts alpha[target] (N,) against the
        # (N, 1) gathered probabilities, giving an (N, N) loss; we implement
        # the clearly-intended per-sample weighting alpha[target_i] * loss_i.
        alpha_t = jnp.asarray(alpha, jnp.float32)[targets]   # XLA gather, cheap
        args.append(jnp.pad(alpha_t, (0, pad)).reshape(n_pad, 1))
        in_specs.append(
            pl.BlockSpec((row_tile, 1), lambda i, j: (i * steps + j, 0)))

    kernel = functools.partial(
        _focal_loss_kernel, gamma=gamma, n_total=N,
        use_alpha=use_alpha, mask_rows=(pad != 0),
    )

    partial = pl.pallas_call(
        kernel,
        out_shape=jax.ShapeDtypeStruct((n_par, row_tile, 1), jnp.float32),
        grid_spec=pltpu.PrefetchScalarGridSpec(
            num_scalar_prefetch=0,
            grid=(n_par, steps),
            in_specs=in_specs,
            out_specs=pl.BlockSpec((1, row_tile, 1), lambda i, j: (i, 0, 0)),
        ),
        compiler_params=pltpu.CompilerParams(
            dimension_semantics=("parallel", "arbitrary"),
            vmem_limit_bytes=48 * 1024 * 1024,
        ),
    )(*args)

    total = jnp.sum(partial)          # tiny (n_par * row_tile) reduce in XLA
    if reduction == "mean":
        return total / jnp.float32(N)
    if reduction == "sum":
        return total
    # TODO(synk): reduction='none' (per-row loss output) is not implemented.
    raise NotImplementedError("reduction must be 'mean' or 'sum'")


def _reference_focal_loss(logits, targets, alpha=None, gamma=2, reduction="mean"):
    p = jax.nn.softmax(logits.astype(jnp.float32), axis=1)
    p_t = jnp.take_along_axis(p, targets[:, None], axis=1)
    a_t = 1.0 if alpha is None else alpha[targets][:, None]
    loss = -a_t * (1.0 - p_t) ** gamma * jnp.log(p_t)
    return loss.mean() if reduction == "mean" else loss.sum()


if __name__ == "__main__":
    key = jax.random.PRNGKey(0)
    k1, k2, k3 = jax.random.split(key, 3)

    # Case 1: module defaults (alpha=None, gamma=2, reduction='mean').
    N, C = 64, 32
    logits = jax.random.normal(k1, (N, C), dtype=jnp.float32)
    targets = jax.random.randint(k2, (N,), 0, C, dtype=jnp.int32)
    out = jax.block_until_ready(focal_loss(logits, targets))
    ref = _reference_focal_loss(logits, targets)
    assert jnp.allclose(out, ref, rtol=1e-5, atol=1e-5), (out, ref)

    # Case 2: ragged N + per-class alpha + sum reduction (exercises row
    # masking and the alpha input path).
    N2, C2 = 50, 40
    logits2 = jax.random.normal(k3, (N2, C2), dtype=jnp.float32)
    targets2 = jax.random.randint(k2, (N2,), 0, C2, dtype=jnp.int32)
    alpha2 = jnp.linspace(0.25, 1.0, C2, dtype=jnp.float32)
    out2 = jax.block_until_ready(
        focal_loss(logits2, targets2, alpha=alpha2, gamma=2, reduction="sum"))
    ref2 = _reference_focal_loss(logits2, targets2, alpha=alpha2, gamma=2,
                                 reduction="sum")
    assert jnp.allclose(out2, ref2, rtol=1e-5, atol=1e-5), (out2, ref2)

    # Case 3: force a two-chunk, multi-step grid (exercises the parallel axis,
    # accumulator init and multi-step accumulation).
    out3 = jax.block_until_ready(
        focal_loss(logits, targets, row_tile=16, num_parallel=2))
    assert jnp.allclose(out3, ref, rtol=1e-5, atol=1e-5), (out3, ref)

    print("KERNEL_OK")
</pallas_src>

<mosaic_0001>
module attributes {stable_mosaic.version = 11 : i64} {
  func.func @_focal_loss_kernel(%arg0: i32, %arg1: i32, %arg2: memref<64x32xf32, #tpu.memory_space<vmem>>, %arg3: memref<64x1xi32, #tpu.memory_space<vmem>>, %arg4: memref<1x64x1xf32, #tpu.memory_space<vmem>>) attributes {dimension_semantics = [#tpu.dimension_semantics<parallel>, #tpu.dimension_semantics<arbitrary>], iteration_bounds = array<i64: 1, 1>, scalar_prefetch = 0 : i64, scratch_operands = 0 : i64, tpu.core_type = #tpu.core_type<tc>, window_params = [{transform_indices = @transform_0, window_bounds = array<i64: 64, 32>}, {transform_indices = @transform_1, window_bounds = array<i64: 64, 1>}, {transform_indices = @transform_2, window_bounds = array<i64: 1, 64, 1>}]} {
    %c0_i32 = arith.constant 0 : i32
    %0 = arith.cmpi eq, %arg1, %c0_i32 : i32
    %1 = arith.extui %0 : i1 to i32
    %c0_i32_0 = arith.constant 0 : i32
    %2 = arith.cmpi ne, %1, %c0_i32_0 : i32
    scf.if %2 {
      %cst_15 = arith.constant 0.000000e+00 : f32
      %33 = vector.broadcast %cst_15 : f32 to vector<1x64x1xf32>
      %c0_16 = arith.constant 0 : index
      %c0_17 = arith.constant 0 : index
      %c0_18 = arith.constant 0 : index
      %34 = vector.load %arg4[%c0_16, %c0_17, %c0_18] : memref<1x64x1xf32, #tpu.memory_space<vmem>>, vector<1x64x1xf32>
      tpu.vector_store %arg4[%c0_16, %c0_17, %c0_18], %33 {strides = array<i32>} : memref<1x64x1xf32, #tpu.memory_space<vmem>>, vector<1x64x1xf32>,
    } else {
    }
    %c0 = arith.constant 0 : index
    %c0_1 = arith.constant 0 : index
    %3 = vector.load %arg2[%c0, %c0_1] : memref<64x32xf32, #tpu.memory_space<vmem>>, vector<64x32xf32>
    %c0_2 = arith.constant 0 : index
    %c0_3 = arith.constant 0 : index
    %4 = vector.load %arg3[%c0_2, %c0_3] : memref<64x1xi32, #tpu.memory_space<vmem>>, vector<64x1xi32>
    %cst = arith.constant dense<0xFF800000> : vector<64xf32>
    %5 = vector.multi_reduction <maximumf>, %3, %cst [1] : vector<64x32xf32> to vector<64xf32>
    %6 = vector.shape_cast %5 : vector<64xf32> to vector<64x1xf32>
    %7 = vector.broadcast %6 : vector<64x1xf32> to vector<64x32xf32>
    %8 = arith.subf %3, %7 : vector<64x32xf32>
    %9 = math.exp %8 : vector<64x32xf32>
    %cst_4 = arith.constant dense<0.000000e+00> : vector<64xf32>
    %10 = vector.multi_reduction <add>, %9, %cst_4 [1] : vector<64x32xf32> to vector<64xf32>
    %11 = vector.shape_cast %10 : vector<64xf32> to vector<64x1xf32>
    %12 = tpu.iota {dimensions = array<i32: 1>} : vector<64x32xi32>
    %13 = vector.broadcast %4 : vector<64x1xi32> to vector<64x32xi32>
    %14 = arith.cmpi eq, %12, %13 : vector<64x32xi32>
    %cst_5 = arith.constant 0.000000e+00 : f32
    %15 = vector.broadcast %cst_5 : f32 to vector<64x32xf32>
    %16 = arith.select %14, %3, %15 : vector<64x32xi1>, vector<64x32xf32>
    %cst_6 = arith.constant dense<0.000000e+00> : vector<64xf32>
    %17 = vector.multi_reduction <add>, %16, %cst_6 [1] : vector<64x32xf32> to vector<64xf32>
    %18 = vector.shape_cast %17 : vector<64xf32> to vector<64x1xf32>
    %19 = arith.subf %18, %6 : vector<64x1xf32>
    %20 = math.log %11 : vector<64x1xf32>
    %21 = arith.subf %19, %20 : vector<64x1xf32>
    %22 = math.exp %21 : vector<64x1xf32>
    %cst_7 = arith.constant 1.000000e+00 : f32
    %23 = vector.broadcast %cst_7 : f32 to vector<64x1xf32>
    %24 = arith.subf %23, %22 : vector<64x1xf32>
    %25 = arith.mulf %24, %24 : vector<64x1xf32>
    %cst_8 = arith.constant 0.000000e+00 : f32
    %26 = vector.broadcast %cst_8 : f32 to vector<64x1xf32>
    %27 = arith.subf %26, %21 : vector<64x1xf32>
    %28 = arith.mulf %25, %27 : vector<64x1xf32>
    %c0_9 = arith.constant 0 : index
    %c0_10 = arith.constant 0 : index
    %c0_11 = arith.constant 0 : index
    %29 = vector.load %arg4[%c0_9, %c0_10, %c0_11] : memref<1x64x1xf32, #tpu.memory_space<vmem>>, vector<1x64x1xf32>
    %30 = vector.shape_cast %28 : vector<64x1xf32> to vector<1x64x1xf32>
    %31 = arith.addf %29, %30 : vector<1x64x1xf32>
    %c0_12 = arith.constant 0 : index
    %c0_13 = arith.constant 0 : index
    %c0_14 = arith.constant 0 : index
    %32 = vector.load %arg4[%c0_12, %c0_13, %c0_14] : memref<1x64x1xf32, #tpu.memory_space<vmem>>, vector<1x64x1xf32>
    tpu.vector_store %arg4[%c0_12, %c0_13, %c0_14], %31 {strides = array<i32>} : memref<1x64x1xf32, #tpu.memory_space<vmem>>, vector<1x64x1xf32>,
    return
  }
  func.func @transform_0(%arg0: i32, %arg1: i32) -> (i32, i32) {
    %c1_i32 = arith.constant 1 : i32
    %0 = arith.muli %arg0, %c1_i32 : i32
    %1 = arith.addi %0, %arg1 : i32
    %c0_i32 = arith.constant 0 : i32
    %c0_i32_0 = arith.constant 0 : i32
    return %1, %c0_i32 : i32, i32
  }
  func.func @transform_1(%arg0: i32, %arg1: i32) -> (i32, i32) {
    %c1_i32 = arith.constant 1 : i32
    %0 = arith.muli %arg0, %c1_i32 : i32
    %1 = arith.addi %0, %arg1 : i32
    %c0_i32 = arith.constant 0 : i32
    %c0_i32_0 = arith.constant 0 : i32
    return %1, %c0_i32 : i32, i32
  }
  func.func @transform_2(%arg0: i32, %arg1: i32) -> (i32, i32, i32) {
    %c0_i32 = arith.constant 0 : i32
    %c0_i32_0 = arith.constant 0 : i32
    %c0_i32_1 = arith.constant 0 : i32
    return %arg0, %c0_i32, %c0_i32_0 : i32, i32, i32
  }
}

</mosaic_0001>

<bundles_post_ra>
// kernel: tpu_custom_call.1
= control target key start
LH: loop header
LB: loop body
LE: loop exit
PB: predicated region body
PF: predicated region fallthrough
CT: control target
= control target key end

     0   :  { %vm84_vm0 = vcmask 261120   ;;  %v397_v3 = vmov 0   ;;  %v157_v29 = vlaneseq  ;;  %vm59_vm9 = vcmask 7168   ;;  %s659_s0 = inlined_call_operand.vmem [shape: f32[64,32], index: 0, kind: input, shape index: {}]   ;;  %s660_s1 = inlined_call_operand.vmem [shape: s32[64,1], index: 1, kind: input, shape index: {}]   ;;  %s661_s2 = inlined_call_operand.vmem [shape: f32[1,64,1], index: 2, kind: output, shape index: {}]  }
   0x1   :  { %v417_v0 = vld [vmem:[%s659_s0 + $0x20] sm:$0xff]  ;;  %v422_v1 = vld [vmem:[%s659_s0 + $0x10] sm:$0xff]  ;;  %346 = vset.pattern.permute.xlu0 %v397_v3  ;;  %348 = vset.pattern.permute.xlu2 %v397_v3  ;;  %v438_v7 = vld [vmem:[%s659_s0 + $0x28] sm:$0xff] }
   0x2   :  { %v427_v2 = vld [vmem:[%s659_s0] sm:$0xff]  ;;  %v97_v4 = vsel %vm84_vm0, %v417_v0, -inf  ;;  %v91_v5 = vsel %vm84_vm0, %v422_v1, -inf  ;;  %347 = vset.pattern.permute.xlu1 %v397_v3  ;;  %v443_v8 = vld [vmem:[%s659_s0 + $0x18] sm:$0xff]  ;;  %v448_v9 = vld [vmem:[%s659_s0 + $0x8] sm:$0xff]  ;;  %v100_v10 = vsel %vm84_vm0, %v438_v7, -inf }
   0x3   :  { %v85_v6 = vsel %vm84_vm0, %v427_v2, -inf  ;;  %98 = vmax.xlane.f32.xlu2 %v97_v4  ;;  %92 = vmax.xlane.f32.xlu1 %v91_v5  ;;  %v94_v11 = vsel %vm84_vm0, %v443_v8, -inf  ;;  %v88_v12 = vsel %vm84_vm0, %v448_v9, -inf  ;;  %v459_v13 = vld [vmem:[%s659_s0 + $0x38] sm:$0xff]  ;;  %v464_v14 = vld [vmem:[%s659_s0 + $0x30] sm:$0xff]  ;;  %v76_v18 = vld [vmem:[%s660_s1] sm:$0xff] }
   0x4   :  { %86 = vmax.xlane.f32.xlu0 %v85_v6  ;;  %v106_v15 = vsel %vm84_vm0, %v459_v13, -inf  ;;  %v103_v16 = vsel %vm84_vm0, %v464_v14, -inf  ;;  %v78_v17 = vld [vmem:[%s660_s1 + $0x10] sm:$0xff]  ;;  %v79_v19 = vld [vmem:[%s660_s1 + $0x18] sm:$0xff]  ;;  %v77_v20 = vld [vmem:[%s660_s1 + $0x8] sm:$0xff]  ;;  %v506_v33 = vand.u32 127, %v157_v29 }
   0x5   :  { %v83_v21 = vld [vmem:[%s660_s1 + $0x38] sm:$0xff]  ;;  %v81_v22 = vld [vmem:[%s660_s1 + $0x28] sm:$0xff]  ;;  %v80_v23 = vld [vmem:[%s660_s1 + $0x20] sm:$0xff] }
   0x6   :  { %v82_v24 = vld [vmem:[%s660_s1 + $0x30] sm:$0xff] }
   0xb   :  { %101 = vmax.xlane.f32.xlu2 %v100_v10  ;;  %95 = vmax.xlane.f32.xlu1 %v94_v11 }
   0xc   :  { %89 = vmax.xlane.f32.xlu0 %v88_v12 }
  0x13   :  { %107 = vmax.xlane.f32.xlu1 %v106_v15 }
  0x14   :  { %104 = vmax.xlane.f32.xlu0 %v103_v16 }
  0x23   :  { %166 = vperm.xlu2 %348, %v78_v17  }
  0x28   :  { %160 = vperm.xlu0 %346, %v76_v18  }
  0x2b   :  { %169 = vperm.xlu2 %348, %v79_v19  }
  0x2c   :  { %163 = vperm.xlu1 %347, %v77_v20  }
  0x30   :  { %181 = vperm.xlu0 %346, %v83_v21  }
  0x33   :  { %175 = vperm.xlu2 %348, %v81_v22  }
  0x34   :  { %172 = vperm.xlu1 %347, %v80_v23  }
  0x3c   :  { %178 = vperm.xlu1 %347, %v82_v24  }
  0x76   :  { %v494_v25 = vpop.xlane.xlu2 %98  ;;  %v504_v31 = vpop.xlane.xlu1 %92 }
  0x77   :  { %v496_v26 = vpop.xlane.xlu0 %86  ;;  %v111_v49 = vsub.f32 %v422_v1, %v504_v31  ;;  %v113_v10 = vsub.f32 %v417_v0, %v494_v25 }
  0x78   :  { %v109_v56 = vsub.f32 %v427_v2, %v496_v26 }
  0x79   :  { %v121_v55 = vmul.f32 1.442695, %v111_v49 }
  0x7a   :  { %v117_v61 = vmul.f32 1.442695, %v109_v56 }
  0x7e   :  { %v498_v27 = vpop.xlane.xlu2 %101  ;;  %v515_v41 = vpop.xlane.xlu1 %95 }
  0x7f   :  { %v500_v28 = vpop.xlane.xlu0 %89  ;;  %v114_v62 = vsub.f32 %v438_v7, %v498_v27 }
  0x80   :  { %v110_v30 = vsub.f32 %v448_v9, %v500_v28 }
  0x82   :  { %v119_v32 = vmul.f32 1.442695, %v110_v30 }
  0x84   :  { %349 = vpow2.f32 %v119_v32 }
  0x86   :  { %v167_v34 = vpop.permute.xlu2 %166  ;;  %v518_v45 = vpop.xlane.xlu1 %107 }
  0x87   :  { %vm185_vm1 = vcmp.eq.s32.totalorder %v506_v33, %v167_v34  ;;  %v509_v35 = vpop.xlane.xlu0 %104  ;;  %v116_v18 = vsub.f32 %v459_v13, %v518_v45  ;;  %v398_v34 = vmov 0.0  }
  0x88   :  { %v193_v36 = vsel %vm185_vm1, %v422_v1, 0.0  ;;  %v115_v37 = vsub.f32 %v464_v14, %v509_v35  ;;  %v127_v1 = vmul.f32 1.442695, %v114_v62  ;;  %61 = vst.msk [vmem:[%s661_s2 + $0x8] sm:$0xff] %vm59_vm9, %v398_v34 }
  0x89   :  { %v205_v38 = vsel %vm84_vm0, %v193_v36, 0.0  ;;  %v131_v20 = vmul.f32 1.442695, %v116_v18  ;;  %60 = vst.msk [vmem:[%s661_s2] sm:$0xff] %vm59_vm9, %v398_v34 }
  0x8a   :  { %206 = vadd.xlane.f32.xlu0 %v205_v38  ;;  %v129_v39 = vmul.f32 1.442695, %v115_v37  ;;  %v350_v40 = vpop.eup %349  ;;  %62 = vst.msk [vmem:[%s661_s2 + $0x10] sm:$0xff] %vm59_vm9, %v398_v34 }
  0x8b   :  { %v136_v43 = vsel %vm84_vm0, %v350_v40, 0.0  ;;  %63 = vst.msk [vmem:[%s661_s2 + $0x18] sm:$0xff] %vm59_vm9, %v398_v34 }
  0x8c   :  { %351 = vpow2.f32 %v129_v39  ;;  %64 = vst.msk [vmem:[%s661_s2 + $0x20] sm:$0xff] %vm59_vm9, %v398_v34 }
  0x8d   :  { %353 = vpow2.f32 %v121_v55  ;;  %65 = vst.msk [vmem:[%s661_s2 + $0x28] sm:$0xff] %vm59_vm9, %v398_v34 }
  0x8e   :  { %v170_v42 = vpop.permute.xlu2 %169  ;;  %355 = vpow2.f32 %v117_v61  ;;  %66 = vst.msk [vmem:[%s661_s2 + $0x30] sm:$0xff] %vm59_vm9, %v398_v34 }
  0x8f   :  { %vm186_vm4 = vcmp.eq.s32.totalorder %v506_v33, %v170_v42  ;;  %357 = vpow2.f32 %v127_v1  ;;  %67 = vst.msk [vmem:[%s661_s2 + $0x38] sm:$0xff] %vm59_vm9, %v398_v34 }
  0x90   :  { %v194_v58 = vsel %vm186_vm4, %v443_v8, 0.0 }
  0x91   :  { %v208_v60 = vsel %vm84_vm0, %v194_v58, 0.0 }
  0x92   :  { %137 = vadd.xlane.f32.xlu0 %v136_v43  ;;  %v352_v44 = vpop.eup %351 }
  0x93   :  { %v151_v47 = vsel %vm84_vm0, %v352_v44, 0.0  ;;  %v354_v5 = vpop.eup %353 }
  0x96   :  { %v176_v46 = vpop.permute.xlu2 %175 }
  0x97   :  { %vm188_vm2 = vcmp.eq.s32.totalorder %v506_v33, %v176_v46 }
  0x98   :  { %v196_v51 = vsel %vm188_vm2, %v438_v7, 0.0  ;;  %v356_v7 = vpop.eup %355 }
  0x99   :  { %v214_v54 = vsel %vm84_vm0, %v196_v51, 0.0  ;;  %v133_v11 = vsel %vm84_vm0, %v356_v7, 0.0  ;;  %v358_v12 = vpop.eup %357 }
  0x9a   :  { %v161_v48 = vpop.permute.xlu0 %160  ;;  %152 = vadd.xlane.f32.xlu0 %v151_v47  ;;  %v148_v16 = vsel %vm84_vm0, %v358_v12, 0.0 }
  0x9b   :  { %vm183_vm3 = vcmp.eq.s32.totalorder %v506_v33, %v161_v48 }
  0x9c   :  { %v191_v50 = vsel %vm183_vm3, %v427_v2, 0.0  ;;  %v112_v2 = vsub.f32 %v443_v8, %v515_v41  ;;  %v125_v8 = vmul.f32 1.442695, %v113_v10 }
  0x9d   :  { %v199_v52 = vsel %vm84_vm0, %v191_v50, 0.0 }
  0x9e   :  { %200 = vadd.xlane.f32.xlu1 %v199_v52  ;;  %v164_v53 = vpop.permute.xlu1 %163  ;;  %v123_v6 = vmul.f32 1.442695, %v112_v2 }
  0x9f   :  { %vm184_vm5 = vcmp.eq.s32.totalorder %v506_v33, %v164_v53 }
  0xa0   :  { %v192_v57 = vsel %vm184_vm5, %v448_v9, 0.0  ;;  %v139_v9 = vsel %vm84_vm0, %v354_v5, 0.0  ;;  %359 = vpow2.f32 %v123_v6 }
  0xa1   :  { %v202_v59 = vsel %vm84_vm0, %v192_v57, 0.0  ;;  %361 = vpow2.f32 %v125_v8 }
  0xa2   :  { %203 = vadd.xlane.f32.xlu2 %v202_v59  ;;  %215 = vadd.xlane.f32.xlu0 %v214_v54  ;;  %363 = vpow2.f32 %v131_v20  ;;  %v182_v29 = vpop.permute.xlu0 %181  ;;  %v304_v54 = vld [vmem:[%s661_s2 + $0x8] sm:$0xff] }
  0xa3   :  { %vm190_vm8 = vcmp.eq.s32.totalorder %v506_v33, %v182_v29 }
  0xa4   :  { %v198_v32 = vsel %vm190_vm8, %v459_v13, 0.0 }
  0xa6   :  { %209 = vadd.xlane.f32.xlu1 %v208_v60  ;;  %v173_v63 = vpop.permute.xlu1 %172  ;;  %v360_v17 = vpop.eup %359 }
  0xa7   :  { %vm187_vm6 = vcmp.eq.s32.totalorder %v506_v33, %v173_v63  ;;  %v142_v19 = vsel %vm84_vm0, %v360_v17, 0.0  ;;  %v362_v22 = vpop.eup %361 }
  0xa8   :  { %v195_v3 = vsel %vm187_vm6, %v417_v0, 0.0  ;;  %v145_v23 = vsel %vm84_vm0, %v362_v22, 0.0  ;;  %v364_v24 = vpop.eup %363 }
  0xa9   :  { %v211_v4 = vsel %vm84_vm0, %v195_v3, 0.0  ;;  %v154_v30 = vsel %vm84_vm0, %v364_v24, 0.0 }
  0xaa   :  { %212 = vadd.xlane.f32.xlu2 %v211_v4 }
  0xae   :  { %140 = vadd.xlane.f32.xlu1 %v139_v9  ;;  %v179_v15 = vpop.permute.xlu1 %178 }
  0xaf   :  { %vm189_vm7 = vcmp.eq.s32.totalorder %v506_v33, %v179_v15 }
  0xb0   :  { %v197_v0 = vsel %vm189_vm7, %v464_v14, 0.0  ;;  %v220_v14 = vsel %vm84_vm0, %v198_v32, 0.0 }
  0xb1   :  { %v217_v21 = vsel %vm84_vm0, %v197_v0, 0.0 }
  0xb2   :  { %134 = vadd.xlane.f32.xlu2 %v133_v11 }
  0xb6   :  { %149 = vadd.xlane.f32.xlu1 %v148_v16 }
  0xba   :  { %143 = vadd.xlane.f32.xlu2 %v142_v19 }
  0xbe   :  { %218 = vadd.xlane.f32.xlu1 %v217_v21 }
  0xc2   :  { %146 = vadd.xlane.f32.xlu2 %v145_v23 }
  0xca   :  { %155 = vadd.xlane.f32.xlu2 %v154_v30 }
  0xd2   :  { %221 = vadd.xlane.f32.xlu2 %v220_v14 }
  0xfd   :  { %v207_v13 = vpop.xlane.xlu0 %206 }
  0xfe   :  { %v225_v56 = vsub.f32 %v207_v13, %v504_v31 }
 0x105   :  { %v138_v33 = vpop.xlane.xlu0 %137 }
 0x106   :  { %365 = vlog2.f32 %v138_v33 }
 0x10c   :  { %v366_v36 = vpop.eup %365 }
 0x10d   :  { %v234_v38 = vmul.f32 0.6931472, %v366_v36  ;;  %v153_v50 = vpop.xlane.xlu0 %152 }
 0x111   :  { %v201_v37 = vpop.xlane.xlu1 %200 }
 0x112   :  { %v223_v62 = vsub.f32 %v201_v37, %v496_v26  ;;  %v303_v37 = vld [vmem:[%s661_s2] sm:$0xff] }
 0x115   :  { %v204_v39 = vpop.xlane.xlu2 %203  ;;  %v216_v3 = vpop.xlane.xlu0 %215 }
 0x116   :  { %v224_v40 = vsub.f32 %v204_v39, %v500_v28  ;;  %v228_v6 = vsub.f32 %v216_v3, %v498_v27 }
 0x118   :  { %v248_v42 = vsub.f32 %v224_v40, %v234_v38 }
 0x119   :  { %v210_v43 = vpop.xlane.xlu1 %209 }
 0x11a   :  { %v257_v44 = vmul.f32 1.442695, %v248_v42  ;;  %v288_v52 = vsub.f32 0.0, %v248_v42  ;;  %v226_v17 = vsub.f32 %v210_v43, %v515_v41 }
 0x11c   :  { %367 = vpow2.f32 %v257_v44 }
 0x11d   :  { %v593_v46 = vpop.xlane.xlu2 %212 }
 0x11e   :  { %v227_v36 = vsub.f32 %v593_v46, %v494_v25 }
 0x121   :  { %v141_v47 = vpop.xlane.xlu1 %140 }
 0x122   :  { %v368_v48 = vpop.eup %367  ;;  %369 = vlog2.f32 %v141_v47 }
 0x123   :  { %v272_v49 = vsub.f32 1.0, %v368_v48 }
 0x125   :  { %v280_v51 = vmul.f32 %v272_v49, %v272_v49  ;;  %v135_v53 = vpop.xlane.xlu2 %134 }
 0x126   :  { %371 = vlog2.f32 %v135_v53 }
 0x127   :  { %v296_v28 = vmul.f32 %v288_v52, %v280_v51  ;;  %373 = vlog2.f32 %v153_v50  ;;  %v308_v50 = vld [vmem:[%s661_s2 + $0x28] sm:$0xff] }
 0x128   :  { %v370_v55 = vpop.eup %369 }
 0x129   :  { %v312_v57 = vadd.f32 %v304_v54, %v296_v28  ;;  %v236_v58 = vmul.f32 0.6931472, %v370_v55  ;;  %v150_v59 = vpop.xlane.xlu1 %149  ;;  %v309_v55 = vld [vmem:[%s661_s2 + $0x30] sm:$0xff] }
 0x12a   :  { %375 = vlog2.f32 %v150_v59 }
 0x12b   :  { %321 = vst.msk [vmem:[%s661_s2 + $0x8] sm:$0xff] %vm59_vm9, %v312_v57  ;;  %v249_v60 = vsub.f32 %v225_v56, %v236_v58 }
 0x12c   :  { %v372_v61 = vpop.eup %371 }
 0x12d   :  { %v259_v63 = vmul.f32 1.442695, %v249_v60  ;;  %v232_v1 = vmul.f32 0.6931472, %v372_v61  ;;  %v144_v2 = vpop.xlane.xlu2 %143  ;;  %v374_v31 = vpop.eup %373  ;;  %v289_v23 = vsub.f32 0.0, %v249_v60  ;;  %v306_v61 = vld [vmem:[%s661_s2 + $0x18] sm:$0xff] }
 0x12e   :  { %377 = vlog2.f32 %v144_v2  ;;  %v244_v11 = vmul.f32 0.6931472, %v374_v31 }
 0x12f   :  { %379 = vpow2.f32 %v259_v63  ;;  %v247_v4 = vsub.f32 %v223_v62, %v232_v1 }
 0x130   :  { %v376_v5 = vpop.eup %375 }
 0x131   :  { %v255_v9 = vmul.f32 1.442695, %v247_v4  ;;  %v242_v7 = vmul.f32 0.6931472, %v376_v5  ;;  %v219_v10 = vpop.xlane.xlu1 %218  ;;  %v287_v13 = vsub.f32 0.0, %v247_v4 }
 0x132   :  { %v229_v12 = vsub.f32 %v219_v10, %v509_v35  ;;  %v305_v35 = vld [vmem:[%s661_s2 + $0x10] sm:$0xff] }
 0x133   :  { %381 = vpow2.f32 %v255_v9  ;;  %v252_v8 = vsub.f32 %v228_v6, %v242_v7 }
 0x134   :  { %v378_v26 = vpop.eup %377  ;;  %v253_v15 = vsub.f32 %v229_v12, %v244_v11 }
 0x135   :  { %v380_v16 = vpop.eup %379  ;;  %v265_v18 = vmul.f32 1.442695, %v252_v8  ;;  %v238_v19 = vmul.f32 0.6931472, %v378_v26  ;;  %v147_v0 = vpop.xlane.xlu2 %146  ;;  %v292_v25 = vsub.f32 0.0, %v252_v8 }
 0x136   :  { %v273_v20 = vsub.f32 1.0, %v380_v16  ;;  %v267_v21 = vmul.f32 1.442695, %v253_v15  ;;  %383 = vlog2.f32 %v147_v0  ;;  %v293_v52 = vsub.f32 0.0, %v253_v15 }
 0x137   :  { %385 = vpow2.f32 %v265_v18  ;;  %v250_v27 = vsub.f32 %v226_v17, %v238_v19  ;;  %v310_v17 = vld [vmem:[%s661_s2 + $0x38] sm:$0xff] }
 0x138   :  { %v281_v22 = vmul.f32 %v273_v20, %v273_v20  ;;  %387 = vpow2.f32 %v267_v21 }
 0x139   :  { %v382_v24 = vpop.eup %381  ;;  %v261_v29 = vmul.f32 1.442695, %v250_v27  ;;  %v290_v60 = vsub.f32 0.0, %v250_v27 }
 0x13a   :  { %v297_v30 = vmul.f32 %v289_v23, %v281_v22  ;;  %v271_v32 = vsub.f32 1.0, %v382_v24 }
 0x13b   :  { %389 = vpow2.f32 %v261_v29 }
 0x13c   :  { %v384_v41 = vpop.eup %383  ;;  %v313_v14 = vadd.f32 %v305_v35, %v297_v30  ;;  %v279_v34 = vmul.f32 %v271_v32, %v271_v32 }
 0x13d   :  { %v386_v33 = vpop.eup %385  ;;  %v240_v38 = vmul.f32 0.6931472, %v384_v41  ;;  %v156_v39 = vpop.xlane.xlu2 %155 }
 0x13e   :  { %v388_v40 = vpop.eup %387  ;;  %322 = vst.msk [vmem:[%s661_s2 + $0x10] sm:$0xff] %vm59_vm9, %v313_v14  ;;  %v295_v42 = vmul.f32 %v287_v13, %v279_v34  ;;  %v276_v43 = vsub.f32 1.0, %v386_v33  ;;  %391 = vlog2.f32 %v156_v39 }
 0x13f   :  { %v277_v44 = vsub.f32 1.0, %v388_v40  ;;  %v251_v47 = vsub.f32 %v227_v36, %v240_v38 }
 0x140   :  { %v311_v48 = vadd.f32 %v303_v37, %v295_v42  ;;  %v284_v49 = vmul.f32 %v276_v43, %v276_v43 }
 0x141   :  { %v390_v46 = vpop.eup %389  ;;  %v285_v51 = vmul.f32 %v277_v44, %v277_v44  ;;  %v263_v53 = vmul.f32 1.442695, %v251_v47  ;;  %v291_v10 = vsub.f32 0.0, %v251_v47 }
 0x142   :  { %320 = vst.msk [vmem:[%s661_s2] sm:$0xff] %vm59_vm9, %v311_v48  ;;  %v300_v54 = vmul.f32 %v292_v25, %v284_v49  ;;  %v274_v28 = vsub.f32 1.0, %v390_v46 }
 0x143   :  { %v301_v56 = vmul.f32 %v293_v52, %v285_v51  ;;  %393 = vpow2.f32 %v263_v53 }
 0x144   :  { %v392_v57 = vpop.eup %391  ;;  %v316_v58 = vadd.f32 %v308_v50, %v300_v54  ;;  %v282_v59 = vmul.f32 %v274_v28, %v274_v28 }
 0x145   :  { %v317_v62 = vadd.f32 %v309_v55, %v301_v56  ;;  %v246_v63 = vmul.f32 0.6931472, %v392_v57  ;;  %v222_v1 = vpop.xlane.xlu2 %221 }
 0x146   :  { %325 = vst.msk [vmem:[%s661_s2 + $0x28] sm:$0xff] %vm59_vm9, %v316_v58  ;;  %v298_v2 = vmul.f32 %v290_v60, %v282_v59  ;;  %v230_v3 = vsub.f32 %v222_v1, %v518_v45  ;;  %v307_v45 = vld [vmem:[%s661_s2 + $0x20] sm:$0xff] }
 0x147   :  { %326 = vst.msk [vmem:[%s661_s2 + $0x30] sm:$0xff] %vm59_vm9, %v317_v62 }
 0x148   :  { %v314_v31 = vadd.f32 %v306_v61, %v298_v2  ;;  %v254_v4 = vsub.f32 %v230_v3, %v246_v63 }
 0x149   :  { %v394_v5 = vpop.eup %393 }
 0x14a   :  { %323 = vst.msk [vmem:[%s661_s2 + $0x18] sm:$0xff] %vm59_vm9, %v314_v31  ;;  %v275_v6 = vsub.f32 1.0, %v394_v5  ;;  %v269_v9 = vmul.f32 1.442695, %v254_v4  ;;  %v294_v16 = vsub.f32 0.0, %v254_v4 }
 0x14c   :  { %v283_v7 = vmul.f32 %v275_v6, %v275_v6  ;;  %395 = vpow2.f32 %v269_v9 }
 0x14e   :  { %v299_v11 = vmul.f32 %v291_v10, %v283_v7 }
 0x150   :  { %v315_v12 = vadd.f32 %v307_v45, %v299_v11 }
 0x152   :  { %v396_v8 = vpop.eup %395  ;;  %324 = vst.msk [vmem:[%s661_s2 + $0x20] sm:$0xff] %vm59_vm9, %v315_v12 }
 0x153   :  { %v278_v26 = vsub.f32 1.0, %v396_v8 }
 0x155   :  { %v286_v15 = vmul.f32 %v278_v26, %v278_v26 }
 0x157   :  { %v302_v18 = vmul.f32 %v294_v16, %v286_v15 }
 0x159   :  { %v318_v19 = vadd.f32 %v310_v17, %v302_v18 }
 0x15b   :  { %327 = vst.msk [vmem:[%s661_s2 + $0x38] sm:$0xff] %vm59_vm9, %v318_v19 }

</bundles_post_ra>
